<compile_context>
chip_gen: v7x
topology: tpu7x:2x2x1
jax: 0.10.0
libtpu: 0.0.40
codegen_flags: <defaults>
</compile_context>

<pallas_src>
import functools

import jax
import jax.numpy as jnp
from jax.experimental import pallas as pl
from jax.experimental.pallas import tpu as pltpu


# ----------------------------------------------------------------------------
# Pallas kernel: o[Cout_t, M_t] (f32, resident across ki) += W @ P; epilogue +shift, ReLU
# ----------------------------------------------------------------------------
def _conv_bn_relu_kernel(w_ref, p_ref, shift_ref, o_ref):
    # w_ref:     (TCO, TK)  bf16 conv weight tile (mask + BN scale already folded)
    # p_ref:     (TK, TM)   bf16 im2col patches tile, [K, M] layout (M lane-dense)
    # shift_ref: (TCO, 1)   f32 folded BN shift = beta - mean * scale
    # o_ref:     (TCO, TM)  f32 output tile; used directly as the accumulator
    ki = pl.program_id(2)

    @pl.when(ki == 0)
    def _():
        o_ref[...] = jnp.zeros_like(o_ref)

    o_ref[...] += jnp.dot(w_ref[...], p_ref[...],
                          preferred_element_type=jnp.float32)

    @pl.when(ki == pl.num_programs(2) - 1)
    def _():
        o_ref[...] = jnp.maximum(o_ref[...] + shift_ref[...], 0.0)  # BN shift + ReLU


def _round_up(x, m):
    return ((x + m - 1) // m) * m


def _cdiv(a, b):
    return -(-a // b)


def _pick_tiles(cout, k, m):
    # Cout tile: sublane dim; multiple of 16 (bf16 sublane packing), up to 256
    # (matches the 2x256^2 MXU rows on v6e/v7x; two passes on v5e's 4x128^2 MXU).
    tco = min(_round_up(cout, 16), 256)

    # K tile: multiple of 128 (aligned MXU contraction, no layout-padded vregs), <= 1024.
    k128 = _round_up(k, 128)
    if k128 <= 1024:
        tk = k128
    else:
        tk = 1024 if (_round_up(k, 1024) - k) <= (_round_up(k, 512) - k) else 512

    # M tile: lane-dense output dim, multiple of 128, up to 2048 (v7x-VMEM-safe).
    tm = 2048
    m128 = _round_up(m, 128)
    while tm > 128 and tm > m128:
        tm //= 2
    while tm > 128 and (_round_up(m, tm) - m) * 2 > tm:      # bound M zero-pad waste
        tm //= 2
    co_blocks = _cdiv(cout, tco)
    while tm > 128 and co_blocks * _cdiv(m, tm) < 2:         # keep both v7x TCs busy
        tm //= 2
    return tco, tm, tk


def _fused_matmul_bn_relu(w_flat, patches, shift):
    """w_flat: [Cout, K] bf16 (mask + BN scale folded), patches: [K, M] bf16,
    shift: [Cout] f32.  Returns [Cout, M] f32 = relu(w_flat @ patches + shift[:, None])."""
    cout, k = w_flat.shape
    _, m = patches.shape
    tco, tm, tk = _pick_tiles(cout, k, m)

    cout_p = _round_up(cout, tco)
    m_p = _round_up(m, tm)
    k_p = _round_up(k, tk)

    # Zero padding is exact (padded K rows contribute 0; padded Cout/M sliced off).
    w_p = jnp.pad(w_flat, ((0, cout_p - cout), (0, k_p - k)))          # bf16, no recast
    p_p = jnp.pad(patches, ((0, k_p - k), (0, m_p - m)))               # bf16, no recast
    s_p = jnp.pad(shift.reshape(cout, 1).astype(jnp.float32),
                  ((0, cout_p - cout), (0, 0)))

    n_co, n_mi, n_ki = cout_p // tco, m_p // tm, k_p // tk
    grid = (n_co, n_mi, n_ki)

    # Honest HBM estimate: weight is re-streamed per M block, patches per Cout block.
    cost = pl.CostEstimate(
        flops=2 * m_p * k_p * cout_p,
        transcendentals=0,
        bytes_accessed=(w_p.size * 2 * n_mi + p_p.size * 2 * n_co
                        + s_p.size * 4 * n_mi + cout_p * m_p * 4),
    )

    # VMEM budget: double-buffered weight / patches / output tiles (+ margin).
    # Max tile config (tco=256, tk=1024, tm=2048) is ~13 MiB -> safe on v7x's 64 MiB.
    # TODO(synk): on v5e/v6e (128 MiB VMEM) the limit + tm/tk tier could be raised.
    footprint = 2 * (tco * tk * 2 + tk * tm * 2 + tco * tm * 4 + tco * 4)
    vmem_limit = min(64 * 1024 * 1024,
                     max(32 * 1024 * 1024, footprint + 8 * 1024 * 1024))

    out = pl.pallas_call(
        _conv_bn_relu_kernel,
        out_shape=jax.ShapeDtypeStruct((cout_p, m_p), jnp.float32),
        grid_spec=pltpu.PrefetchScalarGridSpec(
            num_scalar_prefetch=0,
            grid=grid,
            in_specs=[
                pl.BlockSpec((tco, tk), lambda co, mi, ki: (co, ki)),   # weight
                pl.BlockSpec((tk, tm), lambda co, mi, ki: (ki, mi)),    # patches
                pl.BlockSpec((tco, 1), lambda co, mi, ki: (co, 0)),     # bn shift
            ],
            out_specs=pl.BlockSpec((tco, tm), lambda co, mi, ki: (co, mi)),
        ),
        compiler_params=pltpu.CompilerParams(
            dimension_semantics=("parallel", "parallel", "arbitrary"),
            vmem_limit_bytes=vmem_limit,
        ),
        cost_estimate=cost,
    )(w_p, p_p, s_p)

    return out[:cout, :m]


# ----------------------------------------------------------------------------
# Glue: masked weight, BN folding, bf16 im2col in [K, M] layout (NCHW / PyTorch semantics)
# ----------------------------------------------------------------------------
def my_conv2d_bn_relu(x, conv_weight, weight_mask, bn_gamma, bn_beta,
                      bn_mean, bn_var, *, stride=1, padding=0, eps=1e-5):
    """x: [N, Cin, H, W]; conv_weight: [Cout, Cin, KH, KW]; returns [N, Cout, OH, OW]."""
    n, cin, h, w_sp = x.shape
    cout, _, kh_sz, kw_sz = conv_weight.shape
    oh = (h + 2 * padding - kh_sz) // stride + 1
    ow = (w_sp + 2 * padding - kw_sz) // stride + 1
    m = n * oh * ow
    k = cin * kh_sz * kw_sz

    # UnstructuredMask.apply(conv): element-wise mask on the conv weight.
    w = conv_weight * weight_mask

    # BatchNorm2d (eval mode, running statistics) folded into per-channel scale/shift.
    # TODO(synk): training-mode BN uses batch statistics; eval-mode semantics here.
    scale = bn_gamma / jnp.sqrt(bn_var + eps)                    # [Cout]
    shift = bn_beta - bn_mean * scale                            # [Cout]

    # Fold the BN scale into the conv weight (exact), then cast once to bf16.
    w_flat = (w * scale[:, None, None, None]).reshape(cout, k).astype(jnp.bfloat16)

    # im2col built directly in bf16, producing [K, M] (M ordered n,oh,ow -> lane-dense).
    # TODO(synk): fuse im2col into the kernel (implicit GEMM over KH*KW taps) to avoid
    # materializing this ~KH*KW x read-amplified patches buffer in HBM.
    xb = x.astype(jnp.bfloat16)
    xp = jnp.pad(xb, ((0, 0), (0, 0), (padding, padding), (padding, padding)))
    xp = xp.transpose(1, 0, 2, 3)                                # [Cin, N, Hp, Wp]
    cols = []
    for kh in range(kh_sz):
        for kw in range(kw_sz):
            slab = xp[:, :, kh:kh + stride * oh:stride,
                            kw:kw + stride * ow:stride]          # [Cin, N, OH, OW]
            cols.append(slab.reshape(cin, 1, m))
    patches = jnp.concatenate(cols, axis=1).reshape(k, m)        # [K, M] bf16

    out_flat = _fused_matmul_bn_relu(w_flat, patches, shift.astype(jnp.float32))

    # Channel-major result -> NCHW via a cheap leading-axis swap.
    # TODO(synk): add N as a grid axis so the kernel writes [N, Cout, OH*OW] directly
    # and this post-kernel transpose (extra HBM read+write) disappears.
    return out_flat.reshape(cout, n, oh, ow).transpose(1, 0, 2, 3)


# ----------------------------------------------------------------------------
# Reference (plain JAX, f32) for sanity checking
# ----------------------------------------------------------------------------
def _reference(x, conv_weight, weight_mask, bn_gamma, bn_beta, bn_mean, bn_var,
               *, stride=1, padding=0, eps=1e-5):
    w = conv_weight * weight_mask
    y = jax.lax.conv_general_dilated(
        x, w, window_strides=(stride, stride),
        padding=((padding, padding), (padding, padding)),
        dimension_numbers=("NCHW", "OIHW", "NCHW"))
    scale = (bn_gamma / jnp.sqrt(bn_var + eps))[None, :, None, None]
    shift = (bn_beta - bn_mean * bn_gamma / jnp.sqrt(bn_var + eps))[None, :, None, None]
    return jnp.maximum(y * scale + shift, 0.0)


if __name__ == "__main__":
    # MyConv2dBNRelu(in_channels=4, out_channels=8, kernel_size=3, stride=1,
    #                padding=1, bias=False)
    N, Cin, H, W = 2, 4, 16, 16
    Cout, KH, KW = 8, 3, 3
    stride, padding = 1, 1

    key = jax.random.PRNGKey(0)
    kx, kw, kmask, kg, kb, km, kv = jax.random.split(key, 7)

    x = jax.random.normal(kx, (N, Cin, H, W), dtype=jnp.float32)
    conv_weight = jax.random.normal(kw, (Cout, Cin, KH, KW), dtype=jnp.float32) * 0.1
    # UnstructuredMask: random binary keep-mask (exercises the pruning path).
    weight_mask = jax.random.bernoulli(kmask, p=0.8,
                                       shape=(Cout, Cin, KH, KW)).astype(jnp.float32)
    bn_gamma = 1.0 + 0.1 * jax.random.normal(kg, (Cout,), dtype=jnp.float32)
    bn_beta = 0.1 * jax.random.normal(kb, (Cout,), dtype=jnp.float32)
    bn_mean = 0.05 * jax.random.normal(km, (Cout,), dtype=jnp.float32)
    bn_var = jnp.abs(1.0 + 0.1 * jax.random.normal(kv, (Cout,), dtype=jnp.float32))

    run = jax.jit(functools.partial(my_conv2d_bn_relu, stride=stride, padding=padding))
    out = run(x, conv_weight, weight_mask, bn_gamma, bn_beta, bn_mean, bn_var)
    out = jax.block_until_ready(out)

    ref = _reference(x, conv_weight, weight_mask, bn_gamma, bn_beta, bn_mean, bn_var,
                     stride=stride, padding=padding)
    assert out.shape == (N, Cout, H, W)
    # bf16 matmul operands (f32 accumulation) -> looser tolerance than pure-f32.
    assert jnp.allclose(out, ref, atol=5e-2, rtol=5e-2)

    print("KERNEL_OK")
</pallas_src>

<mosaic_0001>
module attributes {stable_mosaic.version = 11 : i64} {
  func.func @_conv_bn_relu_kernel(%arg0: i32, %arg1: i32, %arg2: i32, %arg3: memref<16x128xbf16, #tpu.memory_space<vmem>>, %arg4: memref<128x256xbf16, #tpu.memory_space<vmem>>, %arg5: memref<16x1xf32, #tpu.memory_space<vmem>>, %arg6: memref<16x256xf32, #tpu.memory_space<vmem>>) attributes {dimension_semantics = [#tpu.dimension_semantics<parallel>, #tpu.dimension_semantics<parallel>, #tpu.dimension_semantics<arbitrary>], iteration_bounds = array<i64: 1, 2, 1>, scalar_prefetch = 0 : i64, scratch_operands = 0 : i64, tpu.core_type = #tpu.core_type<tc>, window_params = [{transform_indices = @transform_0, window_bounds = array<i64: 16, 128>}, {transform_indices = @transform_1, window_bounds = array<i64: 128, 256>}, {transform_indices = @transform_2, window_bounds = array<i64: 16, 1>}, {transform_indices = @transform_3, window_bounds = array<i64: 16, 256>}]} {
    %c0_i32 = arith.constant 0 : i32
    %0 = arith.cmpi eq, %arg2, %c0_i32 : i32
    %1 = arith.extui %0 : i1 to i32
    %c0_i32_0 = arith.constant 0 : i32
    %2 = arith.cmpi ne, %1, %c0_i32_0 : i32
    scf.if %2 {
      %cst_10 = arith.constant 0.000000e+00 : f32
      %12 = vector.broadcast %cst_10 : f32 to vector<16x256xf32>
      %c0_11 = arith.constant 0 : index
      %c0_12 = arith.constant 0 : index
      %13 = vector.load %arg6[%c0_11, %c0_12] : memref<16x256xf32, #tpu.memory_space<vmem>>, vector<16x256xf32>
      tpu.vector_store %arg6[%c0_11, %c0_12], %12 {strides = array<i32>} : memref<16x256xf32, #tpu.memory_space<vmem>>, vector<16x256xf32>,
    } else {
    }
    %c0 = arith.constant 0 : index
    %c0_1 = arith.constant 0 : index
    %3 = vector.load %arg6[%c0, %c0_1] : memref<16x256xf32, #tpu.memory_space<vmem>>, vector<16x256xf32>
    %c0_2 = arith.constant 0 : index
    %c0_3 = arith.constant 0 : index
    %4 = vector.load %arg3[%c0_2, %c0_3] : memref<16x128xbf16, #tpu.memory_space<vmem>>, vector<16x128xbf16>
    %c0_4 = arith.constant 0 : index
    %c0_5 = arith.constant 0 : index
    %5 = vector.load %arg4[%c0_4, %c0_5] : memref<128x256xbf16, #tpu.memory_space<vmem>>, vector<128x256xbf16>
    %cst = arith.constant dense<0.000000e+00> : vector<16x256xf32>
    %6 = tpu.matmul %4, %5, %cst {dimension_numbers = #tpu.dot_dimension_numbers<[1], [0], [0], [1], [0, 0, 1, 1], [], []>} : vector<16x128xbf16>, vector<128x256xbf16>, vector<16x256xf32> -> vector<16x256xf32>
    %7 = arith.addf %3, %6 : vector<16x256xf32>
    %c0_6 = arith.constant 0 : index
    %c0_7 = arith.constant 0 : index
    %8 = vector.load %arg6[%c0_6, %c0_7] : memref<16x256xf32, #tpu.memory_space<vmem>>, vector<16x256xf32>
    tpu.vector_store %arg6[%c0_6, %c0_7], %7 {strides = array<i32>} : memref<16x256xf32, #tpu.memory_space<vmem>>, vector<16x256xf32>,
    %c0_i32_8 = arith.constant 0 : i32
    %9 = arith.cmpi eq, %arg2, %c0_i32_8 : i32
    %10 = arith.extui %9 : i1 to i32
    %c0_i32_9 = arith.constant 0 : i32
    %11 = arith.cmpi ne, %10, %c0_i32_9 : i32
    scf.if %11 {
      %c0_10 = arith.constant 0 : index
      %c0_11 = arith.constant 0 : index
      %12 = vector.load %arg6[%c0_10, %c0_11] : memref<16x256xf32, #tpu.memory_space<vmem>>, vector<16x256xf32>
      %c0_12 = arith.constant 0 : index
      %c0_13 = arith.constant 0 : index
      %13 = vector.load %arg5[%c0_12, %c0_13] : memref<16x1xf32, #tpu.memory_space<vmem>>, vector<16x1xf32>
      %14 = vector.broadcast %13 : vector<16x1xf32> to vector<16x256xf32>
      %15 = arith.addf %12, %14 : vector<16x256xf32>
      %cst_14 = arith.constant 0.000000e+00 : f32
      %16 = vector.broadcast %cst_14 : f32 to vector<16x256xf32>
      %17 = arith.maximumf %15, %16 : vector<16x256xf32>
      %c0_15 = arith.constant 0 : index
      %c0_16 = arith.constant 0 : index
      %18 = vector.load %arg6[%c0_15, %c0_16] : memref<16x256xf32, #tpu.memory_space<vmem>>, vector<16x256xf32>
      tpu.vector_store %arg6[%c0_15, %c0_16], %17 {strides = array<i32>} : memref<16x256xf32, #tpu.memory_space<vmem>>, vector<16x256xf32>,
    } else {
    }
    return
  }
  func.func @transform_0(%arg0: i32, %arg1: i32, %arg2: i32) -> (i32, i32) {
    %c0_i32 = arith.constant 0 : i32
    return %arg0, %arg2 : i32, i32
  }
  func.func @transform_1(%arg0: i32, %arg1: i32, %arg2: i32) -> (i32, i32) {
    %c0_i32 = arith.constant 0 : i32
    return %arg2, %arg1 : i32, i32
  }
  func.func @transform_2(%arg0: i32, %arg1: i32, %arg2: i32) -> (i32, i32) {
    %c0_i32 = arith.constant 0 : i32
    %c0_i32_0 = arith.constant 0 : i32
    return %arg0, %c0_i32 : i32, i32
  }
  func.func @transform_3(%arg0: i32, %arg1: i32, %arg2: i32) -> (i32, i32) {
    %c0_i32 = arith.constant 0 : i32
    return %arg0, %arg1 : i32, i32
  }
}

</mosaic_0001>

<bundles_post_ra>
// kernel: my_conv2d_bn_relu.1
= control target key start
LH: loop header
LB: loop body
LE: loop exit
PB: predicated region body
PF: predicated region fallthrough
CT: control target
= control target key end

     0   :  { %s852_s12 = smov 0   ;;  %s854_s13 = smov 0   ;;  %s973_s0 = inlined_call_operand.vmem [shape: bf16[16,128], index: 0, kind: input, shape index: {}]   ;;  %s974_s1 = inlined_call_operand.vmem [shape: bf16[128,512], index: 1, kind: input, shape index: {}]   ;;  %s975_s2 = inlined_call_operand.vmem [shape: f32[16,1], index: 2, kind: input, shape index: {}]   ;;  %s976_s3 = inlined_call_operand.vmem [shape: f32[16,512], index: 3, kind: output, shape index: {}]  }
   0x1   :  { %s856_s14 = smov 0   ;;  %s858_s15 = smov 0  }
   0x2   :  { %s860_s16 = smov 0  }
   0x3 LB: > { %s28_s17 = sadd.s32 1, %s825_s15  ;;  %s687_s18 = sadd.s32 4294967295, %s829_s16   ;;  %s829_s16 = sphi %s860_s16, %s13_s16   ;;  %s825_s15 = sphi %s858_s15, %s981_s15   ;;  %s821_s14 = sphi %s856_s14, %s980_s14   ;;  %s817_s13 = sphi %s854_s13, %s979_s13   ;;  %s813_s12 = sphi %s852_s12, %s978_s12  }
   0x4   : > { %p30_p0 = scmp.ge.s32.totalorder %s28_s17, 2  ;;  %p76_p1 = scmp.ne.s32.totalorder %s817_s13, %s813_s12 }
   0x5   : > { %p77_p2 = scmp.eq.s32.totalorder %s829_s16, 0  ;;  %p134_p4 = scmp.eq.s32.totalorder %s687_s18, 1 }
   0x6   : > { %s983_s17 = smov (%p30_p0, %s28_s17), 0  ;;  %s69_s20 = sadd.s32 1, %s817_s13 }
   0x7   : > { %p78_p3 = por %p77_p2, %p76_p1  ;;  %s65_s19 = ssub.s32 %s825_s15, %s983_s17 }
   0x8   : > { %p67_p5 = scmp.eq.s32.totalorder %s65_s19, 0  ;;  %p887_p6 = por %p134_p4, %p76_p1 }
   0x9   : > { %p692_p7 = scmp.ge.s32.totalorder %s829_s16, 2 }
   0xa   : > { %s892_s22 = scalar_select %p67_p5, %s817_s13, %s69_s20  }
   0xb   : > { %177 = sbr.rel (%p692_p7) target bundleno = 30 (0x1e), region = 24 }
  0x12   : > { %180 = sbr.rel (!%p78_p3) target bundleno = 30 (0x1e), region = 28  ;;  %s182_s23 = sand.u32 (%p78_p3), 1, %s817_s13  }
  0x13   : > { %s721_s24 = sshll.u32 (%p78_p3), %s825_s15, 3  ;;  %s693_s25 = sshll.u32 (%p78_p3), %s182_s23, 7 }
  0x14   : > { %s900_s28 = scalar_lea.vmem (%p78_p3), %s974_s1, %s721_s24  ;;  %s184_s29 = scalar_lea.vmem (%p78_p3), [#allocation2], %s693_s25 }
  0x15   : > { %v248_v0 = vld [vmem:[%s900_s28] sm:$0xff] (%p78_p3)  ;;  %v250_v1 = vld [vmem:[%s900_s28 + $0x10] sm:$0xff] (%p78_p3) }
  0x16   : > { %v252_v2 = vld [vmem:[%s900_s28 + $0x20] sm:$0xff] (%p78_p3)  ;;  %249 = vst [vmem:[%s184_s29] sm:$0xff] (%p78_p3), %v248_v0  ;;  %251 = vst [vmem:[%s184_s29 + $0x8] sm:$0xff] (%p78_p3), %v250_v1  ;;  %v254_v3 = vld [vmem:[%s900_s28 + $0x30] sm:$0xff] (%p78_p3) }
  0x17   : > { %253 = vst [vmem:[%s184_s29 + $0x10] sm:$0xff] (%p78_p3), %v252_v2  ;;  %v256_v4 = vld [vmem:[%s900_s28 + $0x40] sm:$0xff] (%p78_p3)  ;;  %v258_v5 = vld [vmem:[%s900_s28 + $0x50] sm:$0xff] (%p78_p3)  ;;  %255 = vst [vmem:[%s184_s29 + $0x18] sm:$0xff] (%p78_p3), %v254_v3 }
  0x18   : > { %257 = vst [vmem:[%s184_s29 + $0x20] sm:$0xff] (%p78_p3), %v256_v4  ;;  %259 = vst [vmem:[%s184_s29 + $0x28] sm:$0xff] (%p78_p3), %v258_v5  ;;  %v260_v6 = vld [vmem:[%s900_s28 + $0x60] sm:$0xff] (%p78_p3)  ;;  %v262_v7 = vld [vmem:[%s900_s28 + $0x70] sm:$0xff] (%p78_p3) }
  0x19   : > { %v264_v8 = vld [vmem:[%s900_s28 + $0x80] sm:$0xff]  ;;  %261 = vst [vmem:[%s184_s29 + $0x30] sm:$0xff] %v260_v6  ;;  %263 = vst [vmem:[%s184_s29 + $0x38] sm:$0xff] %v262_v7  ;;  %v266_v9 = vld [vmem:[%s900_s28 + $0x90] sm:$0xff] }
  0x1a   : > { %265 = vst [vmem:[%s184_s29 + $0x40] sm:$0xff] %v264_v8  ;;  %v268_v10 = vld [vmem:[%s900_s28 + $0xa0] sm:$0xff]  ;;  %v270_v11 = vld [vmem:[%s900_s28 + $0xb0] sm:$0xff]  ;;  %267 = vst [vmem:[%s184_s29 + $0x48] sm:$0xff] %v266_v9 }
  0x1b   : > { %269 = vst [vmem:[%s184_s29 + $0x50] sm:$0xff] %v268_v10  ;;  %271 = vst [vmem:[%s184_s29 + $0x58] sm:$0xff] %v270_v11  ;;  %v272_v12 = vld [vmem:[%s900_s28 + $0xc0] sm:$0xff]  ;;  %v274_v13 = vld [vmem:[%s900_s28 + $0xd0] sm:$0xff] }
  0x1c   : > { %v276_v14 = vld [vmem:[%s900_s28 + $0xe0] sm:$0xff]  ;;  %273 = vst [vmem:[%s184_s29 + $0x60] sm:$0xff] %v272_v12  ;;  %275 = vst [vmem:[%s184_s29 + $0x68] sm:$0xff] %v274_v13  ;;  %v278_v15 = vld [vmem:[%s900_s28 + $0xf0] sm:$0xff] }
  0x1d   : > { %277 = vst [vmem:[%s184_s29 + $0x70] sm:$0xff] %v276_v14  ;;  %279 = vst [vmem:[%s184_s29 + $0x78] sm:$0xff] %v278_v15 }
  0x1e PF: > { %p696_p8 = scmp.ge.s32.totalorder %s829_s16, 1  ;;  %p284_p9 = scmp.lt.s32.totalorder %s829_s16, 3 }
  0x20   : > { %p285_p10 = pnand %p696_p8, %p284_p9 }
  0x21   : > { %s291_s30 = sand.u32 (!%p285_p10), 1, %s813_s12   ;;  %v831_v16 = vmov (!%p285_p10), 0   ;;  %v520_v17 = vld [vmem:[%s975_s2] sm:$0xff] (!%p285_p10)  ;;  %v521_v18 = vld [vmem:[%s975_s2 + $0x8] sm:$0xff] (!%p285_p10) }
  0x22   : > { %288 = sbr.rel (%p285_p10) target bundleno = 297 (0x129), region = 66  ;;  %s697_s4 = sshll.u32 (!%p285_p10), %s291_s30, 7  ;;  %494 = vmatprep.mubr.bf16.mxu0 (!%p285_p10), %v831_v16  ;;  %765 = vset.pattern.permute.xlu0 (!%p285_p10), %v831_v16  ;;  %v790_v35 = vld [vmem:[%s973_s0] sm:$0xff] (!%p285_p10)  }
  0x23   : > { %524 = vperm.xlu0 (!%p285_p10), %765, %v520_v17   ;;  %s929_s9 = scalar_lea.vmem (!%p285_p10), [#allocation2], %s697_s4  ;;  %s698_s18 = sshll.u32 (!%p285_p10), %s291_s30, 5 }
  0x24   : > { %v766_v19 = vld [vmem:[%s929_s9 + $0x4] ss:$8 sps:$4 sm:$0xff] (!%p285_p10)   ;;  %v768_v20 = vld [vmem:[%s929_s9] ss:$8 sps:$4 sm:$0xff] (!%p285_p10)   ;;  %v769_v21 = vld [vmem:[%s929_s9 + $0x14] ss:$8 sps:$4 sm:$0xff] (!%p285_p10)  }
  0x25   : > { %462 = vmatprep.subr.bf16.mxu0 (!%p285_p10), %v766_v19  ;;  %v771_v22 = vld [vmem:[%s929_s9 + $0x10] ss:$8 sps:$4 sm:$0xff] (!%p285_p10)   ;;  %v772_v23 = vld [vmem:[%s929_s9 + $0x24] ss:$8 sps:$4 sm:$0xff] (!%p285_p10)   ;;  %v774_v24 = vld [vmem:[%s929_s9 + $0x20] ss:$8 sps:$4 sm:$0xff] (!%p285_p10)  }
  0x26   : > { %463 = vmatpush1.bf16.msra.mxu0 (!%p285_p10), %v768_v20  ;;  %v775_v25 = vld [vmem:[%s929_s9 + $0x34] ss:$8 sps:$4 sm:$0xff] (!%p285_p10)   ;;  %v777_v26 = vld [vmem:[%s929_s9 + $0x30] ss:$8 sps:$4 sm:$0xff] (!%p285_p10)   ;;  %v778_v27 = vld [vmem:[%s929_s9 + $0x44] ss:$8 sps:$4 sm:$0xff] (!%p285_p10)  }
  0x27   : > { %529 = vperm.xlu0 (!%p285_p10), %765, %v521_v18   ;;  %464 = vmatprep.subr.bf16.mxu0 (!%p285_p10), %v769_v21  ;;  %v780_v28 = vld [vmem:[%s929_s9 + $0x40] ss:$8 sps:$4 sm:$0xff] (!%p285_p10)   ;;  %v781_v29 = vld [vmem:[%s929_s9 + $0x54] ss:$8 sps:$4 sm:$0xff] (!%p285_p10)   ;;  %v783_v30 = vld [vmem:[%s929_s9 + $0x50] ss:$8 sps:$4 sm:$0xff] (!%p285_p10)  }
  0x28   : > { %v784_v31 = vld [vmem:[%s929_s9 + $0x64] ss:$8 sps:$4 sm:$0xff] (!%p285_p10)   ;;  %v786_v32 = vld [vmem:[%s929_s9 + $0x60] ss:$8 sps:$4 sm:$0xff] (!%p285_p10)   ;;  %v787_v33 = vld [vmem:[%s929_s9 + $0x74] ss:$8 sps:$4 sm:$0xff] (!%p285_p10)  }
  0x29   : > { %v789_v34 = vld [vmem:[%s929_s9 + $0x70] ss:$8 sps:$4 sm:$0xff]   ;;  %s325_s19 = scalar_lea.vmem [#allocation3], %s698_s18  ;;  %s722_s12 = sshll.u32 (%p887_p6), %s821_s14, 4 }
  0x2a   : > { %465 = vmatpush1.bf16.msra.mxu0 %v771_v22  ;;  %s556_s24 = scalar_lea.vmem (%p887_p6), %s976_s3, %s722_s12 }
  0x2b   : > { %466 = vmatprep.subr.bf16.mxu0 %v772_v23 }
  0x2e   : > { %467 = vmatpush1.bf16.msra.mxu0 %v774_v24 }
  0x2f   : > { %468 = vmatprep.subr.bf16.mxu0 %v775_v25 }
  0x32   : > { %469 = vmatpush1.bf16.msra.mxu0 %v777_v26 }
  0x33   : > { %470 = vmatprep.subr.bf16.mxu0 %v778_v27 }
  0x36   : > { %471 = vmatpush1.bf16.msra.mxu0 %v780_v28 }
  0x37   : > { %472 = vmatprep.subr.bf16.mxu0 %v781_v29 }
  0x3a   : > { %473 = vmatpush1.bf16.msra.mxu0 %v783_v30 }
  0x3b   : > { %474 = vmatprep.subr.bf16.mxu0 %v784_v31 }
  0x3e   : > { %475 = vmatpush1.bf16.msra.mxu0 %v786_v32 }
  0x3f   : > { %476 = vmatprep.subr.bf16.mxu0 %v787_v33 }
  0x42   : > { %477 = vmatpush1.bf16.msra.mxu0 %v789_v34 }
  0x45   : > { %495 = vmatmul.mubr.bf16.vlgmr.msra.gmra.mrb[0].mxu0 %v790_v35 }
  0xa2   : > { %v525_v36 = vpop.permute.xlu0 %524 }
  0xa6   : > { %v530_v43 = vpop.permute.xlu0 %529 }
 0x118   : > { %v496_v37 = vpop.f32.mrb[0].mxu0 }
 0x119   : > { %v498_v38 = vpop.f32.mrb[1].mxu0  ;;  %v532_v41 = vadd.f32 %v525_v36, %v496_v37 }
 0x11a   : > { %v500_v39 = vpop.f32.mrb[2].mxu0  ;;  %v533_v42 = vadd.f32 %v525_v36, %v498_v38  ;;  %550 = sbr.rel (!%p887_p6) target bundleno = 297 (0x129), region = 82 }
 0x11b   : > { %v502_v40 = vpop.f32.mrb[3].mxu0  ;;  %v536_v44 = vmax.f32 %v532_v41, 0.0  ;;  %v534_v45 = vadd.f32 %v530_v43, %v500_v39 }
 0x11c   : > { %v537_v46 = vmax.f32 %v533_v42, 0.0  ;;  %v535_v47 = vadd.f32 %v530_v43, %v502_v40 }
 0x11d   : > { %540 = vst [vmem:[%s325_s19] sm:$0xff] %v536_v44  ;;  %v538_v48 = vmax.f32 %v534_v45, 0.0 }
 0x11e   : > { %541 = vst [vmem:[%s325_s19 + $0x8] sm:$0xff] %v537_v46  ;;  %v539_v49 = vmax.f32 %v535_v47, 0.0 }
 0x11f   : > { %542 = vst [vmem:[%s325_s19 + $0x10] sm:$0xff] %v538_v48 }
 0x120   : > { %543 = vst [vmem:[%s325_s19 + $0x18] sm:$0xff] %v539_v49 }
 0x124   : > { %v569_v50 = vld [vmem:[%s325_s19] sm:$0xff] }
 0x125   : > { %v571_v51 = vld [vmem:[%s325_s19 + $0x8] sm:$0xff]  ;;  %570 = vst [vmem:[%s556_s24] sm:$0xff] %v569_v50 }
 0x126   : > { %v573_v52 = vld [vmem:[%s325_s19 + $0x10] sm:$0xff]  ;;  %572 = vst [vmem:[%s556_s24 + $0x8] sm:$0xff] %v571_v51 }
 0x127   : > { %v575_v53 = vld [vmem:[%s325_s19 + $0x18] sm:$0xff]  ;;  %574 = vst [vmem:[%s556_s24 + $0x20] sm:$0xff] %v573_v52 }
 0x128   : > { %576 = vst [vmem:[%s556_s24 + $0x28] sm:$0xff] %v575_v53 }
 0x129 PF: > { %s13_s16 = sadd.s32 1, %s829_s16   ;;  %s978_s12 = smov %s817_s13 }
 0x12a   : > { %p10_p11 = scmp.ge.s32.totalorder %s13_s16, 4   ;;  %s979_s13 = smov %s892_s22 }
 0x12b   : > { %s980_s14 = smov %s825_s15  ;;  %s981_s15 = smov %s983_s17 }
 0x12c   :  { %12 = sbr.rel (!%p10_p11) target bundleno = 3 (0x3), region = 142 }

</bundles_post_ra>
